<compile_context>
chip_gen: v6e
topology: v6e:2x2x1
jax: 0.10.0
libtpu: 0.0.40
codegen_flags: <defaults>
</compile_context>

<pallas_src>
import jax
import jax.numpy as jnp
from jax.experimental import pallas as pl
from jax.experimental.pallas import tpu as pltpu


def _affine_kernel(gain_ref, bias_ref, x_ref, o_ref):
    # gain_ref / bias_ref live in SMEM as (1,) f32 scalars.
    g = gain_ref[0]
    b = bias_ref[0]
    y = x_ref[...].astype(jnp.float32) * g + b
    if jnp.issubdtype(o_ref.dtype, jnp.integer):
        y = jnp.round(y)
    o_ref[...] = y.astype(o_ref.dtype)


def _default_tile_bytes():
    """~8 MiB tiles on v7x (3.2 TB/s HBM), ~4 MiB on v5e/v6e (already at plateau)."""
    try:
        kind = jax.devices()[0].device_kind.lower()
    except Exception:
        kind = ""
    if "v7" in kind or "7x" in kind:
        return 8 * 1024 * 1024
    return 4 * 1024 * 1024


def _affine_plain(x, gain_f32, bias_f32, out_dtype):
    y = x.astype(jnp.float32) * gain_f32[0] + bias_f32[0]
    if jnp.issubdtype(out_dtype, jnp.integer):
        y = jnp.round(y)
    return y.astype(out_dtype)


def affine(x, gain, bias, *,
           target_tile_bytes=None,
           min_pallas_bytes=256 * 1024,
           donate_x=False):
    """Apply y = x * gain + bias with a Pallas TPU kernel.

    x    : arbitrary-shaped array (e.g. NCHW)
    gain : shape () or (1,) float array
    bias : shape () or (1,) float array
    """
    orig_shape = x.shape
    orig_dtype = x.dtype
    total = x.size
    itemsize = jnp.dtype(orig_dtype).itemsize

    gain_f32 = jnp.asarray(gain, jnp.float32).reshape((1,))
    bias_f32 = jnp.asarray(bias, jnp.float32).reshape((1,))

    # ---- small-input fast path --------------------------------------------
    # A pallas_call has fixed launch + pipeline setup cost; tiny tensors are
    # strictly cheaper as a fused XLA elementwise op.
    if total == 0 or total < 128 or total * itemsize < min_pallas_bytes:
        return _affine_plain(x, gain_f32, bias_f32, orig_dtype).reshape(orig_shape)

    if target_tile_bytes is None:
        target_tile_bytes = _default_tile_bytes()

    # ---- split off the <128-element ragged tail (no whole-array pad) -------
    x_flat = x.reshape(-1)                       # layout-compatible, no HBM copy
    tail = total % 128
    main = total - tail                          # largest 128-aligned prefix
    x_main = x_flat if tail == 0 else x_flat[:main]

    # ---- lane-dense 2D view: widest dividing lane ---------------------------
    lane = 128
    for cand in (1024, 512, 256):
        if main % cand == 0:
            lane = cand
            break
    n_rows = main // lane
    x2d = x_main.reshape(n_rows, lane)

    # ---- dtype-aware tile sizing --------------------------------------------
    # Sub-32-bit dtypes pack along sublanes: keep block_rows a multiple of the
    # packed-sublane count (f32:8, bf16:16, int8/fp8:32) for unmasked ld/st.
    packing = 8 * max(1, 4 // itemsize)
    target_rows = max(packing,
                      (target_tile_bytes // (lane * itemsize)) // packing * packing)

    if n_rows <= target_rows:
        if n_rows >= 2 * packing:
            # Split into ~2 blocks so both v7x TensorCores get work.
            block_rows = pl.cdiv(pl.cdiv(n_rows, 2), packing) * packing
        else:
            block_rows = n_rows                  # tiny: single full-array block
    else:
        block_rows = target_rows
        nblk = pl.cdiv(n_rows, block_rows)
        if nblk > 1 and nblk % 2 == 1:
            # Prefer an even grid count for a balanced 2-TC split.
            block_rows = pl.cdiv(pl.cdiv(n_rows, nblk + 1), packing) * packing

    grid = (pl.cdiv(n_rows, block_rows),)        # ragged edge block handled by Pallas

    tile_bytes = block_rows * lane * itemsize
    vmem_limit = int(min(64 * 1024 * 1024, 4 * tile_bytes + 8 * 1024 * 1024))

    io_aliases = {2: 0} if donate_x else {}      # inputs: (gain, bias, x2d)

    out2d = pl.pallas_call(
        _affine_kernel,
        out_shape=jax.ShapeDtypeStruct((n_rows, lane), orig_dtype),
        grid_spec=pltpu.PrefetchScalarGridSpec(
            num_scalar_prefetch=0,
            grid=grid,
            in_specs=[
                pl.BlockSpec(memory_space=pltpu.MemorySpace.SMEM),   # gain (1,) f32
                pl.BlockSpec(memory_space=pltpu.MemorySpace.SMEM),   # bias (1,) f32
                pl.BlockSpec((block_rows, lane), lambda i: (i, 0)),
            ],
            out_specs=pl.BlockSpec((block_rows, lane), lambda i: (i, 0)),
        ),
        compiler_params=pltpu.CompilerParams(
            dimension_semantics=("parallel",),   # shards grid across v7x's 2 TCs
            vmem_limit_bytes=vmem_limit,
        ),
        input_output_aliases=io_aliases,
    )(gain_f32, bias_f32, x2d)

    out_main = out2d.reshape(main)
    if tail == 0:
        return out_main.reshape(orig_shape)

    # <128-element tail in plain JAX (negligible), then concat back.
    y_tail = _affine_plain(x_flat[main:], gain_f32, bias_f32, orig_dtype)
    return jnp.concatenate([out_main, y_tail]).reshape(orig_shape)


if __name__ == "__main__":
    key = jax.random.PRNGKey(0)

    # Small NCHW input consistent with a typical conv-style feature map.
    x = jax.random.normal(key, (2, 4, 16, 16), dtype=jnp.float32)
    gain = jnp.ones((1,), dtype=jnp.float32)     # nn.Parameter(torch.ones(1))
    bias = jnp.zeros((1,), dtype=jnp.float32)    # nn.Parameter(torch.zeros(1))

    # 1) Force the Pallas kernel path on the small test input.
    y = jax.block_until_ready(affine(x, gain, bias, min_pallas_bytes=0))
    y_ref = x * gain + bias
    assert y.shape == x.shape and y.dtype == x.dtype
    assert jnp.allclose(y, y_ref, atol=1e-6, rtol=1e-6)

    # 2) Default path: same small input takes the plain-JAX fast path.
    y_fast = jax.block_until_ready(affine(x, gain, bias))
    assert jnp.allclose(y_fast, y_ref, atol=1e-6, rtol=1e-6)

    # 3) Non-trivial gain/bias, medium size -> multi-block grid (2-TC split).
    g2 = jnp.full((1,), 1.5, dtype=jnp.float32)
    b2 = jnp.full((1,), -0.25, dtype=jnp.float32)
    xm = jax.random.normal(jax.random.PRNGKey(0), (8, 8, 32, 32), dtype=jnp.float32)
    ym = jax.block_until_ready(affine(xm, g2, b2, min_pallas_bytes=0))
    assert jnp.allclose(ym, xm * g2 + b2, atol=1e-6, rtol=1e-6)

    # 4) Ragged total (1155 elems): kernel on 128-aligned prefix + plain-JAX tail.
    xr = jax.random.normal(jax.random.PRNGKey(0), (3, 5, 7, 11), dtype=jnp.float32)
    yr = jax.block_until_ready(affine(xr, g2, b2, min_pallas_bytes=0))
    assert yr.shape == xr.shape and yr.dtype == xr.dtype
    assert jnp.allclose(yr, xr * g2 + b2, atol=1e-6, rtol=1e-6)

    print("KERNEL_OK")
</pallas_src>

<mosaic_0001>
module attributes {stable_mosaic.version = 11 : i64} {
  func.func @_affine_kernel(%arg0: i32, %arg1: memref<1xf32, #tpu.memory_space<smem>>, %arg2: memref<1xf32, #tpu.memory_space<smem>>, %arg3: memref<2x1024xf32, #tpu.memory_space<vmem>>, %arg4: memref<2x1024xf32, #tpu.memory_space<vmem>>) attributes {dimension_semantics = [#tpu.dimension_semantics<parallel>], iteration_bounds = array<i64: 1>, scalar_prefetch = 0 : i64, scratch_operands = 0 : i64, tpu.core_type = #tpu.core_type<tc>, window_params = [{transform_indices = @transform_0, window_bounds = array<i64: 1>}, {transform_indices = @transform_1, window_bounds = array<i64: 1>}, {transform_indices = @transform_2, window_bounds = array<i64: 2, 1024>}, {transform_indices = @transform_3, window_bounds = array<i64: 2, 1024>}]} {
    %c0 = arith.constant 0 : index
    %0 = memref.load %arg1[%c0] : memref<1xf32, #tpu.memory_space<smem>>
    %c0_0 = arith.constant 0 : index
    %1 = memref.load %arg2[%c0_0] : memref<1xf32, #tpu.memory_space<smem>>
    %c0_1 = arith.constant 0 : index
    %c0_2 = arith.constant 0 : index
    %2 = vector.load %arg3[%c0_1, %c0_2] : memref<2x1024xf32, #tpu.memory_space<vmem>>, vector<2x1024xf32>
    %3 = vector.broadcast %0 : f32 to vector<2x1024xf32>
    %4 = arith.mulf %2, %3 : vector<2x1024xf32>
    %5 = vector.broadcast %1 : f32 to vector<2x1024xf32>
    %6 = arith.addf %4, %5 : vector<2x1024xf32>
    %c0_3 = arith.constant 0 : index
    %c0_4 = arith.constant 0 : index
    %7 = vector.load %arg4[%c0_3, %c0_4] : memref<2x1024xf32, #tpu.memory_space<vmem>>, vector<2x1024xf32>
    tpu.vector_store %arg4[%c0_3, %c0_4], %6 {strides = array<i32>} : memref<2x1024xf32, #tpu.memory_space<vmem>>, vector<2x1024xf32>,
    return
  }
  func.func @transform_0(%arg0: i32) -> i32 {
    %c0_i32 = arith.constant 0 : i32
    %c0_i32_0 = arith.constant 0 : i32
    return %c0_i32 : i32
  }
  func.func @transform_1(%arg0: i32) -> i32 {
    %c0_i32 = arith.constant 0 : i32
    %c0_i32_0 = arith.constant 0 : i32
    return %c0_i32 : i32
  }
  func.func @transform_2(%arg0: i32) -> (i32, i32) {
    %c0_i32 = arith.constant 0 : i32
    %c0_i32_0 = arith.constant 0 : i32
    return %arg0, %c0_i32 : i32, i32
  }
  func.func @transform_3(%arg0: i32) -> (i32, i32) {
    %c0_i32 = arith.constant 0 : i32
    %c0_i32_0 = arith.constant 0 : i32
    return %arg0, %c0_i32 : i32, i32
  }
}

</mosaic_0001>

<bundles_post_ra>
// kernel: tpu_custom_call.1
= control target key start
LH: loop header
LB: loop body
LE: loop exit
PB: predicated region body
PF: predicated region fallthrough
CT: control target
= control target key end

     0   :  { %10 = vsyncpa [#allocation5], 0  ;;  %s136_s0 = inlined_call_operand.<no memory space> [shape: f32[1], index: 0, kind: input, shape index: {}]   ;;  %s137_s1 = inlined_call_operand.<no memory space> [shape: f32[1], index: 1, kind: input, shape index: {}]   ;;  %s138_s2 = inlined_call_operand.hbm [shape: f32[2,1024], index: 2, kind: input, shape index: {}]   ;;  %s139_s3 = inlined_call_operand.hbm [shape: f32[2,1024], index: 3, kind: output, shape index: {}]  }
   0x1   :  { %11 = vsyncpa [#allocation6], 0  ;;  %s102_s12 = smov [#allocation4]  }
   0x2   :  { %s22_s13 = sshll.u32 %s102_s12, 4  ;;  %s23_s13 = int_to_ptr.vmem [resolvable:$true] %s22_s13 }
   0x3   :  { %s66_s14 = scalar_lea.vmem %s23_s13, 256  ;;  %p71_p1 = scmp.lt.s32.totalorder %s23_s13, %s23_s13 }
   0x4   :  { %p67_p0 = scmp.ne.s32.totalorder %s23_s13, %s66_s14  ;;  %p72_p2 = scmp.lt.s32.totalorder %s66_s14, %s66_s14 }
   0x6   :  { %p73_p3 = por %p72_p2, %p71_p1 }
   0x8   :  { %p74_p4 = pnand %p73_p3, %p67_p0 }
   0xa   :  { %77 = shalt.err (!%p74_p4)
}
   0xb   :  { %25 = dma.hbm_to_vmem [thread:$0]  %s138_s2, 256, %s23_s13, [#allocation5]  }
   0xc   :  { %98 = dma.done.wait [#allocation5], 256  }
   0xd   :  { %99 = vsyncadd [#allocation5], 4294967040  ;;  %v33_v0 = vstv %s136_s0  ;;  %v31_v1 = vld [vmem:[#allocation4] sm:$0xff]  ;;  %v36_v2 = vstv %s137_s1  ;;  %v32_v3 = vld [vmem:[#allocation4 + $0x8] sm:$0xff]  ;;  %s103_s21 = smov [#allocation7]  }
   0xe   :  { %s47_s22 = sshll.u32 %s103_s21, 4  ;;  %v34_v4 = vmul.f32 %v33_v0, %v31_v1  ;;  %v35_v5 = vmul.f32 %v33_v0, %v32_v3  ;;  %s48_s22 = int_to_ptr.vmem [resolvable:$true] %s47_s22 }
   0xf   :  { %s78_s2 = scalar_lea.vmem %s48_s22, 256  ;;  %p83_p6 = scmp.lt.s32.totalorder %s48_s22, %s48_s22 }
  0x10   :  { %v37_v6 = vadd.f32 %v36_v2, %v34_v4  ;;  %v38_v7 = vadd.f32 %v36_v2, %v35_v5  ;;  %p79_p5 = scmp.ne.s32.totalorder %s48_s22, %s78_s2  ;;  %p84_p7 = scmp.lt.s32.totalorder %s78_s2, %s78_s2 }
  0x12   :  { %39 = vst [vmem:[#allocation7] sm:$0xff] %v37_v6  ;;  %40 = vst [vmem:[#allocation7 + $0x8] sm:$0xff] %v38_v7  ;;  %p85_p8 = por %p84_p7, %p83_p6 }
  0x14   :  { %p86_p9 = pnand %p85_p8, %p79_p5 }
  0x16   :  { %89 = shalt.err (!%p86_p9)
}
  0x17   :  { %50 = dma.vmem_to_hbm [thread:$0]  %s48_s22, 256, %s139_s3, [#allocation6]  }
  0x18   :  { %100 = dma.done.wait [#allocation6], 256  }
  0x19   :  { %101 = vsyncadd [#allocation6], 4294967040 }
  0x1a   :  { %54 = vsyncpa [#allocation5], 1 }
  0x1b   :  { %55 = vsyncpa [#allocation6], 1 }

</bundles_post_ra>
